<compile_context>
chip_gen: v6e
topology: v6e:2x2x1
jax: 0.10.0
libtpu: 0.0.40
codegen_flags: <defaults>
</compile_context>

<pallas_src>
import functools

import jax
import jax.numpy as jnp
from jax.experimental import pallas as pl
from jax.experimental.pallas import tpu as pltpu


def _mlp_kernel(x_ref, w1_ref, b1_ref, w2_ref, b2_ref, wo_ref, bo_ref, out_ref):
    """Fused: relu(relu(x @ W1 + b1) @ W2 + b2) @ Wo + bo, f32 accumulation."""
    mxu_dtype = w1_ref.dtype                       # bf16 weights -> bf16 MXU inputs
    x = x_ref[...]                                 # already bf16 (cast in wrapper)
    # Layer 1: MXU matmul (f32 accumulation), bias add + ReLU in f32 on the VPU.
    h = jnp.dot(x, w1_ref[...], preferred_element_type=jnp.float32) + b1_ref[...]
    h = jnp.maximum(h, 0.0)
    # Layer 2.
    h = jnp.dot(h.astype(mxu_dtype), w2_ref[...],
                preferred_element_type=jnp.float32) + b2_ref[...]
    h = jnp.maximum(h, 0.0)
    # Output layer (lane-padded to a multiple of 128 -> unmasked full-width stores).
    o = jnp.dot(h.astype(mxu_dtype), wo_ref[...],
                preferred_element_type=jnp.float32) + bo_ref[...]
    out_ref[...] = o


def _round_up(v, m):
    return ((v + m - 1) // m) * m


def _pick_tile(batch, tm_default):
    """Batch tile: multiple of 16 (bf16 sublanes); >=2 grid steps when batch allows."""
    b_pad = _round_up(batch, 16)
    tm = max(16, min(_round_up(tm_default, 16), b_pad))
    # If one tile would cover the whole batch but the batch can be split, split it
    # so the "parallel" batch axis has >=2 iterations (v7x has 2 TensorCores).
    if batch >= 32 and tm >= b_pad:
        tm = _round_up((batch + 1) // 2, 16)
    return tm


@functools.partial(jax.jit, static_argnames=("tm", "out_dim", "vocab_len"))
def _mlp_small_jit(x, w1, b1, w2, b2, wo_p, bo_p, *, tm, out_dim, vocab_len):
    """Pad batch, run the fused kernel, slice/reshape to (B, 6, vocab_len) f32."""
    B, num_i = x.shape
    num_h = w1.shape[1]
    out_pad = wo_p.shape[1]

    # Stream x as bf16: halves input DMA bytes; MXU accumulates in f32 anyway.
    x_p = x.astype(w1.dtype)
    B_pad = _round_up(B, tm)
    if B_pad != B:
        x_p = jnp.pad(x_p, ((0, B_pad - B), (0, 0)))

    grid = (B_pad // tm,)
    resident = lambda a: pl.BlockSpec(a.shape, lambda i: (0,) * a.ndim)

    weight_bytes = sum(int(a.size) * a.dtype.itemsize
                       for a in (w1, b1, w2, b2, wo_p, bo_p))
    cost = pl.CostEstimate(
        flops=2 * B_pad * (num_i * num_h + num_h * num_h + num_h * out_pad),
        transcendentals=0,
        bytes_accessed=int(x_p.size) * x_p.dtype.itemsize
        + B_pad * out_pad * 4
        + weight_bytes,
    )

    out = pl.pallas_call(
        _mlp_kernel,
        out_shape=jax.ShapeDtypeStruct((B_pad, out_pad), jnp.float32),
        grid=grid,
        in_specs=[
            pl.BlockSpec((tm, num_i), lambda i: (i, 0)),   # x: streams over batch tiles
            resident(w1), resident(b1),                    # weights/biases: VMEM-resident
            resident(w2), resident(b2),
            resident(wo_p), resident(bo_p),
        ],
        out_specs=pl.BlockSpec((tm, out_pad), lambda i: (i, 0)),
        compiler_params=pltpu.CompilerParams(
            dimension_semantics=("parallel",),             # shard batch grid across TCs (v7x)
        ),
        cost_estimate=cost,
    )(x_p, w1, b1, w2, b2, wo_p, bo_p)

    return out[:B, :out_dim].reshape(B, 6, vocab_len)


def mlp_small_forward(x, params, *, tm=1024):
    """Fused MLP forward. Returns (out, None, None) with out shaped (B, 6, vocab_len) f32."""
    vocab_len = params["vocab_len"]
    out_dim = 6 * vocab_len
    B = x.shape[0]
    if B == 0:
        return jnp.zeros((0, 6, vocab_len), jnp.float32), None, None

    tm = _pick_tile(B, tm)
    out = _mlp_small_jit(
        x, params["w1"], params["b1"], params["w2"], params["b2"],
        params["wo"], params["bo"],
        tm=tm, out_dim=out_dim, vocab_len=vocab_len,
    )
    return out, None, None


def init_params(key, num_i, num_h, vocab_len, weight_dtype=jnp.bfloat16):
    """Deterministic init matching torch.nn.Linear shapes; weights stored (in, out).

    Weights are kept in `weight_dtype` (bf16 by default: native MXU fast path on
    v6e/v7x, portable on v5e); biases stay f32 since bias-add/ReLU run in f32.
    The output projection (wo, bo) is lane-padded to a multiple of 128 HERE, once,
    so the forward path never re-pads weights per call.
    """
    k1, k2, k3, k4, k5, k6 = jax.random.split(key, 6)

    def lin(kw, kb, fan_in, fan_out):
        bound = 1.0 / jnp.sqrt(jnp.float32(fan_in))
        w = jax.random.uniform(kw, (fan_in, fan_out), jnp.float32, -bound, bound)
        b = jax.random.uniform(kb, (1, fan_out), jnp.float32, -bound, bound)
        return w.astype(weight_dtype), b

    w1, b1 = lin(k1, k2, num_i, num_h)
    w2, b2 = lin(k3, k4, num_h, num_h)
    wo, bo = lin(k5, k6, num_h, vocab_len * 6)

    out_dim = vocab_len * 6
    out_pad = _round_up(out_dim, 128)
    if out_pad != out_dim:
        wo = jnp.pad(wo, ((0, 0), (0, out_pad - out_dim)))
        bo = jnp.pad(bo, ((0, 0), (0, out_pad - out_dim)))

    return {"w1": w1, "b1": b1, "w2": w2, "b2": b2, "wo": wo, "bo": bo,
            "vocab_len": vocab_len}


def _reference_forward(x, params):
    """Pure-JAX reference mirroring the kernel's casting (bf16 MXU inputs, f32 accum)."""
    dt = params["w1"].dtype
    vocab_len = params["vocab_len"]
    out_dim = 6 * vocab_len
    h = jnp.dot(x.astype(dt), params["w1"],
                preferred_element_type=jnp.float32) + params["b1"]
    h = jnp.maximum(h, 0.0)
    h = jnp.dot(h.astype(dt), params["w2"],
                preferred_element_type=jnp.float32) + params["b2"]
    h = jnp.maximum(h, 0.0)
    o = jnp.dot(h.astype(dt), params["wo"],
                preferred_element_type=jnp.float32) + params["bo"]
    return o[:, :out_dim].reshape(x.shape[0], 6, vocab_len)


if __name__ == "__main__":
    num_i, num_h, vocab_len = 32, 32, 16
    batch = 8

    key = jax.random.PRNGKey(0)
    kx, kp = jax.random.split(key)
    x = jax.random.normal(kx, (batch, num_i), jnp.float32)
    params = init_params(kp, num_i, num_h, vocab_len)

    out, _, _ = mlp_small_forward(x, params)
    out = jax.block_until_ready(out)

    assert out.shape == (batch, 6, vocab_len)
    assert out.dtype == jnp.float32

    ref = _reference_forward(x, params)
    assert jnp.allclose(out, ref, rtol=2e-2, atol=2e-2), "kernel mismatch vs reference"

    # Exercise a batch large enough to produce a multi-step (>=2) batch grid
    # (the v7x megacore path) and re-check correctness.
    x_big = jax.random.normal(kx, (48, num_i), jnp.float32)
    out_big, _, _ = mlp_small_forward(x_big, params)
    out_big = jax.block_until_ready(out_big)
    ref_big = _reference_forward(x_big, params)
    assert out_big.shape == (48, 6, vocab_len)
    assert jnp.allclose(out_big, ref_big, rtol=2e-2, atol=2e-2), "multi-tile mismatch"

    print("KERNEL_OK")
</pallas_src>

<mosaic_0001>
module attributes {stable_mosaic.version = 11 : i64} {
  func.func @_mlp_kernel(%arg0: i32, %arg1: memref<16x32xbf16, #tpu.memory_space<vmem>>, %arg2: memref<32x32xbf16, #tpu.memory_space<vmem>>, %arg3: memref<1x32xf32, #tpu.memory_space<vmem>>, %arg4: memref<32x32xbf16, #tpu.memory_space<vmem>>, %arg5: memref<1x32xf32, #tpu.memory_space<vmem>>, %arg6: memref<32x128xbf16, #tpu.memory_space<vmem>>, %arg7: memref<1x128xf32, #tpu.memory_space<vmem>>, %arg8: memref<16x128xf32, #tpu.memory_space<vmem>>) attributes {dimension_semantics = [#tpu.dimension_semantics<parallel>], iteration_bounds = array<i64: 1>, scalar_prefetch = 0 : i64, scratch_operands = 0 : i64, tpu.core_type = #tpu.core_type<tc>, window_params = [{transform_indices = @transform_0, window_bounds = array<i64: 16, 32>}, {pipeline_mode = #tpu.pipeline_mode<synchronous>, transform_indices = @transform_1, window_bounds = array<i64: 32, 32>}, {pipeline_mode = #tpu.pipeline_mode<synchronous>, transform_indices = @transform_2, window_bounds = array<i64: 1, 32>}, {pipeline_mode = #tpu.pipeline_mode<synchronous>, transform_indices = @transform_3, window_bounds = array<i64: 32, 32>}, {pipeline_mode = #tpu.pipeline_mode<synchronous>, transform_indices = @transform_4, window_bounds = array<i64: 1, 32>}, {pipeline_mode = #tpu.pipeline_mode<synchronous>, transform_indices = @transform_5, window_bounds = array<i64: 32, 128>}, {pipeline_mode = #tpu.pipeline_mode<synchronous>, transform_indices = @transform_6, window_bounds = array<i64: 1, 128>}, {transform_indices = @transform_7, window_bounds = array<i64: 16, 128>}]} {
    %c0 = arith.constant 0 : index
    %c0_0 = arith.constant 0 : index
    %0 = vector.load %arg1[%c0, %c0_0] : memref<16x32xbf16, #tpu.memory_space<vmem>>, vector<16x32xbf16>
    %c0_1 = arith.constant 0 : index
    %c0_2 = arith.constant 0 : index
    %1 = vector.load %arg2[%c0_1, %c0_2] : memref<32x32xbf16, #tpu.memory_space<vmem>>, vector<32x32xbf16>
    %cst = arith.constant dense<0.000000e+00> : vector<16x32xf32>
    %2 = tpu.matmul %0, %1, %cst {dimension_numbers = #tpu.dot_dimension_numbers<[1], [0], [0], [1], [0, 0, 1, 1], [], []>} : vector<16x32xbf16>, vector<32x32xbf16>, vector<16x32xf32> -> vector<16x32xf32>
    %c0_3 = arith.constant 0 : index
    %c0_4 = arith.constant 0 : index
    %3 = vector.load %arg3[%c0_3, %c0_4] : memref<1x32xf32, #tpu.memory_space<vmem>>, vector<1x32xf32>
    %4 = vector.broadcast %3 : vector<1x32xf32> to vector<16x32xf32>
    %5 = arith.addf %2, %4 : vector<16x32xf32>
    %cst_5 = arith.constant 0.000000e+00 : f32
    %6 = vector.broadcast %cst_5 : f32 to vector<16x32xf32>
    %7 = arith.maximumf %5, %6 : vector<16x32xf32>
    %8 = arith.truncf %7 : vector<16x32xf32> to vector<16x32xbf16>
    %c0_6 = arith.constant 0 : index
    %c0_7 = arith.constant 0 : index
    %9 = vector.load %arg4[%c0_6, %c0_7] : memref<32x32xbf16, #tpu.memory_space<vmem>>, vector<32x32xbf16>
    %cst_8 = arith.constant dense<0.000000e+00> : vector<16x32xf32>
    %10 = tpu.matmul %8, %9, %cst_8 {dimension_numbers = #tpu.dot_dimension_numbers<[1], [0], [0], [1], [0, 0, 1, 1], [], []>} : vector<16x32xbf16>, vector<32x32xbf16>, vector<16x32xf32> -> vector<16x32xf32>
    %c0_9 = arith.constant 0 : index
    %c0_10 = arith.constant 0 : index
    %11 = vector.load %arg5[%c0_9, %c0_10] : memref<1x32xf32, #tpu.memory_space<vmem>>, vector<1x32xf32>
    %12 = vector.broadcast %11 : vector<1x32xf32> to vector<16x32xf32>
    %13 = arith.addf %10, %12 : vector<16x32xf32>
    %cst_11 = arith.constant 0.000000e+00 : f32
    %14 = vector.broadcast %cst_11 : f32 to vector<16x32xf32>
    %15 = arith.maximumf %13, %14 : vector<16x32xf32>
    %16 = arith.truncf %15 : vector<16x32xf32> to vector<16x32xbf16>
    %c0_12 = arith.constant 0 : index
    %c0_13 = arith.constant 0 : index
    %17 = vector.load %arg6[%c0_12, %c0_13] : memref<32x128xbf16, #tpu.memory_space<vmem>>, vector<32x128xbf16>
    %cst_14 = arith.constant dense<0.000000e+00> : vector<16x128xf32>
    %18 = tpu.matmul %16, %17, %cst_14 {dimension_numbers = #tpu.dot_dimension_numbers<[1], [0], [0], [1], [0, 0, 1, 1], [], []>} : vector<16x32xbf16>, vector<32x128xbf16>, vector<16x128xf32> -> vector<16x128xf32>
    %c0_15 = arith.constant 0 : index
    %c0_16 = arith.constant 0 : index
    %19 = vector.load %arg7[%c0_15, %c0_16] : memref<1x128xf32, #tpu.memory_space<vmem>>, vector<1x128xf32>
    %20 = vector.broadcast %19 : vector<1x128xf32> to vector<16x128xf32>
    %21 = arith.addf %18, %20 : vector<16x128xf32>
    %c0_17 = arith.constant 0 : index
    %c0_18 = arith.constant 0 : index
    %22 = vector.load %arg8[%c0_17, %c0_18] : memref<16x128xf32, #tpu.memory_space<vmem>>, vector<16x128xf32>
    tpu.vector_store %arg8[%c0_17, %c0_18], %21 {strides = array<i32>} : memref<16x128xf32, #tpu.memory_space<vmem>>, vector<16x128xf32>,
    return
  }
  func.func @transform_0(%arg0: i32) -> (i32, i32) {
    %c0_i32 = arith.constant 0 : i32
    %c0_i32_0 = arith.constant 0 : i32
    return %arg0, %c0_i32 : i32, i32
  }
  func.func @transform_1(%arg0: i32) -> (i32, i32) {
    %c0_i32 = arith.constant 0 : i32
    %c0_i32_0 = arith.constant 0 : i32
    %c0_i32_1 = arith.constant 0 : i32
    return %c0_i32, %c0_i32_0 : i32, i32
  }
  func.func @transform_2(%arg0: i32) -> (i32, i32) {
    %c0_i32 = arith.constant 0 : i32
    %c0_i32_0 = arith.constant 0 : i32
    %c0_i32_1 = arith.constant 0 : i32
    return %c0_i32, %c0_i32_0 : i32, i32
  }
  func.func @transform_3(%arg0: i32) -> (i32, i32) {
    %c0_i32 = arith.constant 0 : i32
    %c0_i32_0 = arith.constant 0 : i32
    %c0_i32_1 = arith.constant 0 : i32
    return %c0_i32, %c0_i32_0 : i32, i32
  }
  func.func @transform_4(%arg0: i32) -> (i32, i32) {
    %c0_i32 = arith.constant 0 : i32
    %c0_i32_0 = arith.constant 0 : i32
    %c0_i32_1 = arith.constant 0 : i32
    return %c0_i32, %c0_i32_0 : i32, i32
  }
  func.func @transform_5(%arg0: i32) -> (i32, i32) {
    %c0_i32 = arith.constant 0 : i32
    %c0_i32_0 = arith.constant 0 : i32
    %c0_i32_1 = arith.constant 0 : i32
    return %c0_i32, %c0_i32_0 : i32, i32
  }
  func.func @transform_6(%arg0: i32) -> (i32, i32) {
    %c0_i32 = arith.constant 0 : i32
    %c0_i32_0 = arith.constant 0 : i32
    %c0_i32_1 = arith.constant 0 : i32
    return %c0_i32, %c0_i32_0 : i32, i32
  }
  func.func @transform_7(%arg0: i32) -> (i32, i32) {
    %c0_i32 = arith.constant 0 : i32
    %c0_i32_0 = arith.constant 0 : i32
    return %arg0, %c0_i32 : i32, i32
  }
}

</mosaic_0001>

<bundles_post_ra>
// kernel: _mlp_small_jit.1
= control target key start
LH: loop header
LB: loop body
LE: loop exit
PB: predicated region body
PF: predicated region fallthrough
CT: control target
= control target key end

     0   :  { %12 = vsyncpa [#allocation3], 0  ;;  %s494_s0 = inlined_call_operand.vmem [shape: bf16[16,32], index: 0, kind: input, shape index: {}]   ;;  %s495_s1 = inlined_call_operand.vmem [shape: bf16[32,32], index: 1, kind: input, shape index: {}]   ;;  %s496_s2 = inlined_call_operand.hbm [shape: f32[1,32], index: 2, kind: input, shape index: {}]   ;;  %s497_s3 = inlined_call_operand.hbm [shape: bf16[32,32], index: 3, kind: input, shape index: {}]   ;;  %s498_s4 = inlined_call_operand.hbm [shape: f32[1,32], index: 4, kind: input, shape index: {}]   ;;  %s499_s5 = inlined_call_operand.vmem [shape: bf16[32,128], index: 5, kind: input, shape index: {}]   ;;  %s500_s6 = inlined_call_operand.vmem [shape: f32[1,128], index: 6, kind: input, shape index: {}]   ;;  %s501_s7 = inlined_call_operand.vmem [shape: f32[16,128], index: 7, kind: output, shape index: {}]  }
   0x1   :  { %13 = vsyncpa [#allocation5], 0  ;;  %s411_s24 = smov [#allocation4]  }
   0x2   :  { %s33_s25 = sshll.u32 %s411_s24, 4  ;;  %s34_s25 = int_to_ptr.vmem [resolvable:$true] %s33_s25 }
   0x3   :  { %s355_s26 = scalar_lea.vmem %s34_s25, 256  ;;  %p360_p1 = scmp.lt.s32.totalorder %s34_s25, %s34_s25 }
   0x4   :  { %p356_p0 = scmp.ne.s32.totalorder %s34_s25, %s355_s26  ;;  %p361_p2 = scmp.lt.s32.totalorder %s355_s26, %s355_s26 }
   0x6   :  { %p362_p3 = por %p361_p2, %p360_p1 }
   0x8   :  { %p363_p4 = pnand %p362_p3, %p356_p0 }
   0xa   :  { %366 = shalt.err (!%p363_p4)
}
   0xb   :  { %s412_s27 = smov 64   ;;  %s413_s28 = smov 4  }
   0xc   :  { %39 = dma.hbm_to_vmem [thread:$0]  %s497_s3, 256, %s34_s25, [#allocation5], %s412_s27, %s412_s27, %s413_s28  }
   0xd   :  { %s414_s8 = smov [#allocation2]   ;;  %s415_s10 = smov [#allocation6]  }
   0xe   :  { %s24_s9 = sshll.u32 %s414_s8, 4  ;;  %s46_s11 = sshll.u32 %s415_s10, 4  ;;  %s25_s9 = int_to_ptr.vmem [resolvable:$true] %s24_s9  ;;  %s47_s11 = int_to_ptr.vmem [resolvable:$true] %s46_s11 }
   0xf   :  { %s375_s12 = scalar_lea.vmem %s25_s9, 16  ;;  %s379_s13 = scalar_lea.vmem %s25_s9, 32 }
  0x10   :  { %p376_p5 = scmp.ne.s32.totalorder %s25_s9, %s375_s12  ;;  %p380_p6 = scmp.lt.s32.totalorder %s25_s9, %s25_s9 }
  0x11   :  { %p381_p7 = scmp.lt.s32.totalorder %s379_s13, %s375_s12 }
  0x13   :  { %p382_p8 = por %p381_p7, %p380_p6 }
  0x15   :  { %p383_p9 = pnand %p382_p8, %p376_p5 }
  0x17   :  { %386 = shalt.err (!%p383_p9)
}
  0x18   :  { %27 = dma.hbm_to_vmem [thread:$0]  %s496_s2, 16, %s25_s9, [#allocation3]  }
  0x19   :  { %s395_s16 = scalar_lea.vmem %s47_s11, 16  ;;  %s399_s3 = scalar_lea.vmem %s47_s11, 32 }
  0x1a   :  { %p396_p10 = scmp.ne.s32.totalorder %s47_s11, %s395_s16  ;;  %p400_p11 = scmp.lt.s32.totalorder %s47_s11, %s47_s11 }
  0x1b   :  { %p401_p12 = scmp.lt.s32.totalorder %s399_s3, %s395_s16 }
  0x1d   :  { %p402_p13 = por %p401_p12, %p400_p11 }
  0x1f   :  { %p403_p0 = pnand %p402_p13, %p396_p10 }
  0x21   :  { %406 = shalt.err (!%p403_p0)
}
  0x22   :  { %49 = dma.hbm_to_vmem [thread:$0]  %s498_s4, 16, %s47_s11, [#allocation5]  }
  0x23   :  { %407 = dma.done.wait [#allocation3], 16  }
  0x24   :  { %408 = vsyncadd [#allocation3], 4294967280 }
  0x25   :  { %409 = dma.done.wait [#allocation5], 272  }
  0x26   :  { %410 = vsyncadd [#allocation5], 4294967024  ;;  %v416_v0 = vmov 0.0   ;;  %vm417_vm0 = vmmov 0   ;;  %v340_v1 = vld [vmem:[%s495_s1 + $0x8] sm:$0xff]   ;;  %v341_v2 = vld [vmem:[%s495_s1] sm:$0xff]  }
  0x27   :  { %309 = vmatprep.subr.bf16.mxu0 %v416_v0  ;;  %313 = vmatprep.mubr.msk.bf16.mxu0 %vm417_vm0, %v416_v0  ;;  %v342_v3 = vld [vmem:[%s494_s0] sm:$0xff]   ;;  %vm94_vm1 = vcmask 261120   ;;  %v343_v4 = vld [vmem:[#allocation4 + $0x8] sm:$0xff]   ;;  %v292_v18 = vld [vmem:[#allocation6] ss:$0 sm:$0xff] }
  0x28   :  { %317 = vmatprep.subr.bf16.mxu1 %v416_v0  ;;  %321 = vmatprep.mubr.msk.bf16.mxu1 %vm417_vm0, %v416_v0  ;;  %v344_v5 = vld [vmem:[#allocation4] sm:$0xff]   ;;  %v287_v6 = vld [vmem:[#allocation2] ss:$0 sm:$0xff] }
  0x29   :  { %310 = vmatpush3.bf16.msra.mxu0 %v340_v1  ;;  %318 = vmatpush3.bf16.msra.mxu1 %v343_v4  ;;  %v345_v16 = vld [vmem:[%s499_s5 + $0x8] sm:$0xff]   ;;  %v346_v17 = vld [vmem:[%s499_s5] sm:$0xff]  }
  0x2a   :  { %311 = vmatprep.subr.bf16.mxu0 %v416_v0  ;;  %319 = vmatprep.subr.bf16.mxu1 %v416_v0  ;;  %v296_v28 = vld [vmem:[%s500_s6] ss:$0 sm:$0xff] }
  0x2d   :  { %312 = vmatpush3.bf16.msra.mxu0 %v341_v2  ;;  %320 = vmatpush3.bf16.msra.mxu1 %v344_v5 }
  0x2e   :  { %325 = vmatprep.subr.bf16.mxu0 %v416_v0 }
  0x30   :  { %314 = vmatmul.mubr.msk.bf16.vlgmr.msra.gmra.mxu0 %vm94_vm1, %v342_v3 }
  0x31   :  { %329 = vmatprep.mubr.msk.bf16.mxu0 %vm417_vm0, %v416_v0  ;;  %326 = vmatpush3.bf16.msra.mxu0 %v345_v16 }
  0x32   :  { %327 = vmatprep.subr.bf16.mxu0 %v416_v0 }
  0x35   :  { %328 = vmatpush3.bf16.msra.mxu0 %v346_v17 }
  0xf0   :  { %v132_v7 = vpop.f32.mrf.mxu0 }
  0xf1   :  { %v133_v9 = vadd.f32 %v287_v6, %v132_v7 }
  0xf2   :  { %v315_v8 = vpop.f32.mrf.mxu0 }
  0xf3   :  { %v139_v13 = vmax.f32 %v133_v9, 0.0 }
  0xf4   :  { %v135_v10 = vpop.f32.mrf.mxu0 }
  0xf5   :  { %v136_v11 = vadd.f32 %v287_v6, %v135_v10 }
  0xf6   :  { %v316_v12 = vpop.f32.mrf.mxu0 }
  0xf7   :  { %v140_v14 = vmax.f32 %v136_v11, 0.0 }
  0xf9   :  { %v141_v15 = vpack.c.bf16 %v140_v14, %v139_v13 }
  0xfb   :  { %322 = vmatmul.mubr.msk.bf16.vlgmr.msra.gmra.mxu1 %vm94_vm1, %v141_v15 }
 0x1bb   :  { %v202_v19 = vpop.f32.mrf.mxu1 }
 0x1bc   :  { %v203_v21 = vadd.f32 %v292_v18, %v202_v19 }
 0x1bd   :  { %v323_v20 = vpop.f32.mrf.mxu1 }
 0x1be   :  { %v209_v25 = vmax.f32 %v203_v21, 0.0 }
 0x1bf   :  { %v205_v22 = vpop.f32.mrf.mxu1 }
 0x1c0   :  { %v206_v23 = vadd.f32 %v292_v18, %v205_v22 }
 0x1c1   :  { %v324_v24 = vpop.f32.mrf.mxu1 }
 0x1c2   :  { %v210_v26 = vmax.f32 %v206_v23, 0.0 }
 0x1c4   :  { %v211_v27 = vpack.c.bf16 %v210_v26, %v209_v25 }
 0x1c6   :  { %330 = vmatmul.mubr.msk.bf16.vlgmr.msra.gmra.mxu0 %vm94_vm1, %v211_v27 }
 0x286   :  { %v272_v29 = vpop.f32.mrf.mxu0 }
 0x287   :  { %v273_v30 = vadd.f32 %v296_v28, %v272_v29 }
 0x288   :  { %v331_v31 = vpop.f32.mrf.mxu0 }
 0x289   :  { %279 = vst [vmem:[%s501_s7] sm:$0xff] %v273_v30 }
 0x28a   :  { %v275_v32 = vpop.f32.mrf.mxu0 }
 0x28b   :  { %v276_v33 = vadd.f32 %v296_v28, %v275_v32 }
 0x28c   :  { %v332_v34 = vpop.f32.mrf.mxu0 }
 0x28d   :  { %280 = vst [vmem:[%s501_s7 + $0x8] sm:$0xff] %v276_v33 }
 0x28e   :  { %285 = vsyncpa [#allocation3], 1 }
 0x28f   :  { %286 = vsyncpa [#allocation5], 1 }

</bundles_post_ra>
